<compile_context>
chip_gen: v7x
topology: tpu7x:2x2x1
jax: 0.10.0
libtpu: 0.0.40
codegen_flags: <defaults>
</compile_context>

<pallas_src>
import jax
import jax.numpy as jnp
from jax.experimental import pallas as pl
from jax.experimental.pallas import tpu as pltpu


_LANE = 128
_SUBLANE = 8
# Resident-table path budget: keep the (double-buffered) table well inside the
# smallest per-core VMEM (v7x: 64 MiB physical, 32 MiB default scoped).
_RESIDENT_TABLE_BUDGET_BYTES = 16 * 1024 * 1024
_RESIDENT_VMEM_LIMIT_BYTES = 48 * 1024 * 1024


def _round_up(x, m):
    return (x + m - 1) // m * m


# ---------------------------------------------------------------------------
# Path A (default): per-row HBM gather driven by scalar-prefetched indices.
# ---------------------------------------------------------------------------
def _row_copy_kernel(idx_ref, row_ref, o_ref):
    # idx_ref (SMEM, scalar-prefetched) is consumed by the index_maps only;
    # the body is a pure lane-dense row copy.
    del idx_ref
    o_ref[...] = row_ref[...]


def _lookup_hbm_gather(idx, table):
    """out[r, :] = table[idx[r], :]; HBM traffic ~ 2 * batch * dim bytes."""
    # TODO(synk): for very large batches, gather several rows per grid step via
    # manual make_async_copy double-buffering to cut per-step (~0.35us) overhead.
    n_classes, dim = table.shape
    itemsize = table.dtype.itemsize
    dim_p = _round_up(dim, _LANE)
    if dim_p != dim:
        table = jnp.zeros((n_classes, dim_p), table.dtype).at[:, :dim].set(table)
    # Singleton middle axis keeps the last-two block dims (1, dim_p) aligned
    # (full-dim, multiple-of-128) while the gathered axis is the leading one.
    table3 = table.reshape(n_classes, 1, dim_p)

    b = idx.shape[0]
    out = pl.pallas_call(
        _row_copy_kernel,
        out_shape=jax.ShapeDtypeStruct((b, 1, dim_p), table.dtype),
        grid_spec=pltpu.PrefetchScalarGridSpec(
            num_scalar_prefetch=1,
            grid=(b,),
            in_specs=[
                # Data-dependent gather straight from HBM: block index along
                # axis 0 is the prefetched class id for this grid step.
                pl.BlockSpec((1, 1, dim_p), lambda i, idx_ref: (idx_ref[i], 0, 0)),
            ],
            out_specs=pl.BlockSpec((1, 1, dim_p), lambda i, idx_ref: (i, 0, 0)),
        ),
        compiler_params=pltpu.CompilerParams(
            dimension_semantics=("parallel",),  # rows independent; splits on v7x
        ),
        cost_estimate=pl.CostEstimate(
            flops=0,
            transcendentals=0,
            bytes_accessed=int(2 * b * dim_p * itemsize + 4 * b),
        ),
    )(idx, table3)
    out = out.reshape(b, dim_p)
    return out[:, :dim] if dim_p != dim else out


# ---------------------------------------------------------------------------
# Path B: small table, large batch — VMEM-resident table + one-hot MXU gather.
# ---------------------------------------------------------------------------
def _onehot_gather_kernel(idx_ref, table_ref, o_ref):
    # idx_ref: (TB, 1) int32 block; table_ref: full (ncls_p, dim_p) table,
    # VMEM-resident across the grid (constant index_map); o_ref: (TB, dim_p).
    idx_col = idx_ref[...]
    tb = o_ref.shape[0]
    n_cls = table_ref.shape[0]
    cls_iota = jax.lax.broadcasted_iota(jnp.int32, (tb, n_cls), 1)
    onehot = (cls_iota == idx_col).astype(table_ref.dtype)
    o_ref[...] = jnp.dot(
        onehot, table_ref[...], preferred_element_type=jnp.float32
    ).astype(o_ref.dtype)


def _lookup_resident(idx, table, rows_per_block):
    n_classes, dim = table.shape
    itemsize = table.dtype.itemsize
    dim_p = _round_up(dim, _LANE)
    ncls_p = _round_up(n_classes, _SUBLANE)
    # Block rows: multiple of the packed sublane count for this dtype
    # (f32: 8, bf16: 16, int8/fp8: 32) so output vregs are fully packed.
    sub = _SUBLANE * max(1, 4 // itemsize)
    b = idx.shape[0]
    tb = max(sub, min(_round_up(rows_per_block, sub), _round_up(b, sub)))
    b_p = _round_up(b, tb)

    if (ncls_p, dim_p) != (n_classes, dim):
        table = jnp.zeros((ncls_p, dim_p), table.dtype).at[:n_classes, :dim].set(table)
    if b_p != b:
        # Padding rows gather class 0 and are sliced off below.
        # Invariant: the pad value must remain a valid class index.
        idx_col = jnp.zeros((b_p, 1), jnp.int32).at[:b, 0].set(idx)
    else:
        idx_col = idx[:, None]

    out = pl.pallas_call(
        _onehot_gather_kernel,
        out_shape=jax.ShapeDtypeStruct((b_p, dim_p), table.dtype),
        grid=(b_p // tb,),
        in_specs=[
            pl.BlockSpec((tb, 1), lambda i: (i, 0)),
            # Constant block index -> single HBM->VMEM DMA; table stays resident.
            # TODO(synk): add pipeline_mode=pl.Buffered(1) to single-buffer the
            # constant table once verified on the deployment jax version.
            pl.BlockSpec((ncls_p, dim_p), lambda i: (0, 0)),
        ],
        out_specs=pl.BlockSpec((tb, dim_p), lambda i: (i, 0)),
        compiler_params=pltpu.CompilerParams(
            # "arbitrary": with "parallel" each v7x core would re-DMA the full
            # table, and the table read dominates at the sizes this path serves.
            dimension_semantics=("arbitrary",),
            vmem_limit_bytes=_RESIDENT_VMEM_LIMIT_BYTES,
        ),
        cost_estimate=pl.CostEstimate(
            flops=int(2 * b_p * ncls_p * dim_p),
            transcendentals=0,
            bytes_accessed=int(
                ncls_p * dim_p * itemsize + b_p * dim_p * itemsize + 4 * b_p
            ),
        ),
    )(idx_col, table)
    if b_p != b or dim_p != dim:
        out = out[:b, :dim]
    return out


# ---------------------------------------------------------------------------
# Wrapper + module
# ---------------------------------------------------------------------------
def proxy_lookup(y_true, proxies, *, rows_per_block=128, force_path=None):
    """Pallas embedding gather: returns proxies[y_true] (y_true of any shape)."""
    n_classes, dim = proxies.shape
    # Clamp: VMEM/HBM refs have no OOB protection, so an out-of-range class id
    # would otherwise silently read garbage.
    idx = jnp.clip(jnp.reshape(y_true, (-1,)).astype(jnp.int32), 0, n_classes - 1)
    b = idx.shape[0]

    table_bytes = (
        _round_up(n_classes, _SUBLANE) * _round_up(dim, _LANE) * proxies.dtype.itemsize
    )
    if force_path == "resident":
        use_resident = True
    elif force_path == "hbm":
        use_resident = False
    else:
        # Resident table only pays off when it is small AND the batch re-reads
        # it enough to beat gathering just the requested rows from HBM.
        use_resident = (table_bytes <= _RESIDENT_TABLE_BUDGET_BYTES) and (b >= n_classes)

    if use_resident:
        out = _lookup_resident(idx, proxies, rows_per_block)
    else:
        out = _lookup_hbm_gather(idx, proxies)
    return out.reshape(y_true.shape + (dim,))


class ProxyNet:
    """JAX/Pallas mirror of the PyTorch ProxyNet (frozen-embedding forward)."""

    def __init__(self, n_classes, dim, proxies):
        assert proxies.shape == (n_classes, dim)
        self.n_classes = n_classes
        self.dim = dim
        self.proxies = jnp.asarray(proxies, jnp.float32)  # requires_grad=False

    def __call__(self, y_true, *, force_path=None):
        return proxy_lookup(y_true, self.proxies, force_path=force_path)


if __name__ == "__main__":
    key = jax.random.PRNGKey(0)
    key, pk, yk = jax.random.split(key, 3)

    n_classes, dim, batch = 32, 128, 8
    proxies = jax.random.normal(pk, (n_classes, dim), jnp.float32)
    y_true = jax.random.randint(yk, (batch,), 0, n_classes, jnp.int32)

    net = ProxyNet(n_classes, dim, proxies)
    ref = jnp.take(proxies, y_true, axis=0)  # pure-JAX reference (nn.Embedding)

    # Default (heuristic) path.
    out = net(y_true)
    jax.block_until_ready(out)
    assert out.shape == (batch, dim)
    assert jnp.allclose(out, ref)

    # Exercise both kernel paths explicitly at the small demo shapes.
    out_hbm = net(y_true, force_path="hbm")
    out_res = net(y_true, force_path="resident")
    jax.block_until_ready((out_hbm, out_res))
    assert jnp.allclose(out_hbm, ref)
    assert jnp.allclose(out_res, ref)

    print("KERNEL_OK")
</pallas_src>

<mosaic_0001>
module attributes {stable_mosaic.version = 11 : i64} {
  func.func @_row_copy_kernel(%arg0: i32, %arg1: memref<8xi32, #tpu.memory_space<smem>>, %arg2: memref<1x1x128xf32, #tpu.memory_space<vmem>>, %arg3: memref<1x1x128xf32, #tpu.memory_space<vmem>>) attributes {dimension_semantics = [#tpu.dimension_semantics<parallel>], iteration_bounds = array<i64: 8>, scalar_prefetch = 1 : i64, scratch_operands = 0 : i64, tpu.core_type = #tpu.core_type<tc>, window_params = [{transform_indices = @transform_0, window_bounds = array<i64: 1, 1, 128>}, {transform_indices = @transform_1, window_bounds = array<i64: 1, 1, 128>}]} {
    %c0 = arith.constant 0 : index
    %c0_0 = arith.constant 0 : index
    %c0_1 = arith.constant 0 : index
    %0 = vector.load %arg2[%c0, %c0_0, %c0_1] : memref<1x1x128xf32, #tpu.memory_space<vmem>>, vector<1x1x128xf32>
    %c0_2 = arith.constant 0 : index
    %c0_3 = arith.constant 0 : index
    %c0_4 = arith.constant 0 : index
    %1 = vector.load %arg3[%c0_2, %c0_3, %c0_4] : memref<1x1x128xf32, #tpu.memory_space<vmem>>, vector<1x1x128xf32>
    tpu.vector_store %arg3[%c0_2, %c0_3, %c0_4], %0 {strides = array<i32>} : memref<1x1x128xf32, #tpu.memory_space<vmem>>, vector<1x1x128xf32>,
    return
  }
  func.func @transform_0(%arg0: i32, %arg1: memref<8xi32, #tpu.memory_space<smem>>) -> (i32, i32, i32) {
    %0 = arith.index_cast %arg0 : i32 to index
    %1 = memref.load %arg1[%0] : memref<8xi32, #tpu.memory_space<smem>>
    %c0_i32 = arith.constant 0 : i32
    %c0_i32_0 = arith.constant 0 : i32
    %c0_i32_1 = arith.constant 0 : i32
    return %1, %c0_i32, %c0_i32_0 : i32, i32, i32
  }
  func.func @transform_1(%arg0: i32, %arg1: memref<8xi32, #tpu.memory_space<smem>>) -> (i32, i32, i32) {
    %c0_i32 = arith.constant 0 : i32
    %c0_i32_0 = arith.constant 0 : i32
    %c0_i32_1 = arith.constant 0 : i32
    return %arg0, %c0_i32, %c0_i32_0 : i32, i32, i32
  }
}

</mosaic_0001>

<bundles_post_ra>
// kernel: tpu_custom_call.1
= control target key start
LH: loop header
LB: loop body
LE: loop exit
PB: predicated region body
PF: predicated region fallthrough
CT: control target
= control target key end

     0   :  { %s654_s0 = inlined_call_operand.hbm [shape: s32[8], index: 0, kind: input, shape index: {}]   ;;  %s655_s1 = inlined_call_operand.hbm [shape: f32[32,1,128], index: 1, kind: input, shape index: {}]   ;;  %s656_s2 = inlined_call_operand.hbm [shape: f32[8,1,128], index: 2, kind: output, shape index: {}]  }
   0x1   :  { %s298_s11 = scalar_lea.hbm %s654_s0, 16 }
   0x2   :  { %p299_p0 = scmp.ne.s32.totalorder %s654_s0, %s298_s11  ;;  %p302_p1 = scmp.lt.u32.totalorder %s298_s11, %s654_s0 }
   0x4   :  { %p304_p2 = pnand %p302_p1, %p299_p0 }
   0x6   :  { %307 = shalt.err (!%p304_p2)  }
   0x7   :  { %s432_s16 = smov [#allocation3]  }
   0x8   :  { %8 = dma.hbm_to_smem %s654_s0, 16, %s432_s16, [#allocation2] }
   0x9   :  { %394 = dma.done.wait [#allocation2], 16 }
   0xa   :  { %395 = vsyncadd [#allocation2], 4294967280 }
   0xb   :  { %10 = sfence }
   0xc   :  { %11 = vsyncpa [#allocation5], 0 }
   0xd   :  { %13 = vsyncpa [#allocation5 + $0x1], 0 }
   0xe   :  { %14 = vsyncpa [#allocation6], 0 }
   0xf   :  { %16 = vsyncpa [#allocation6 + $0x1], 0  ;;  %s462_s19 = smov 0   ;;  %s464_s20 = smov 0  }
  0x10   :  { %s466_s21 = smov 0   ;;  %s468_s22 = smov 0  }
  0x11   :  { %s470_s23 = smov 0   ;;  %s472_s24 = smov 0  }
  0x12   :  { %s474_s0 = smov 0  }
  0x13 LB: > { %s496_s25 = sadd.s32 4294967295, %s430_s0   ;;  %s215_s26 = sadd.s32 4294967294, %s430_s0   ;;  %s430_s0 = sphi %s474_s0, %s674_s0   ;;  %s426_s24 = sphi %s472_s24, %s673_s24   ;;  %s422_s23 = sphi %s470_s23, %s672_s23   ;;  %s418_s22 = sphi %s468_s22, %s671_s22   ;;  %s414_s21 = sphi %s466_s21, %s670_s21   ;;  %s410_s20 = sphi %s464_s20, %s669_s20   ;;  %s406_s19 = sphi %s462_s19, %s668_s19  }
  0x14   : > { %s500_s27 = sadd.s32 1, %s430_s0   ;;  %s26_s28 = sld [smem:[#allocation3 + %s430_s0]] }
  0x15   : > { %s27_s29 = sld [smem:[#allocation3 + %s500_s27]]  ;;  %s31_s30 = sadd.s32 1, %s426_s24 }
  0x16   : > { %p38_p3 = scmp.ne.s32.totalorder %s426_s24, %s422_s23  ;;  %p39_p4 = scmp.eq.s32.totalorder %s430_s0, 0 }
  0x17   : > { %p44_p5 = scmp.ne.s32.totalorder %s422_s23, %s418_s22  ;;  %p45_p6 = scmp.eq.s32.totalorder %s496_s25, 0 }
  0x18   : > { %p510_p7 = por %p39_p4, %p38_p3  ;;  %s54_s4 = ssub.s32 %s430_s0, %s500_s27 }
  0x19   : > { %p516_p8 = por %p45_p6, %p44_p5  ;;  %p55_p9 = scmp.eq.s32.totalorder %s54_s4, 0 }
  0x1a   : > { %s57_s6 = sadd.s32 1, %s414_s21  ;;  %p67_p10 = scmp.ne.s32.totalorder %s414_s21, %s410_s20 }
  0x1b   : > { %s660_s5 = scalar_select %p516_p8, 1, 0 }
  0x1c   : > { %s28_s7 = ssub.s32 %s26_s28, %s27_s29  ;;  %p68_p11 = scmp.eq.s32.totalorder %s496_s25, 7 }
  0x1d   : > { %p29_p12 = scmp.eq.s32.totalorder %s28_s7, 0  ;;  %p73_p13 = scmp.ne.s32.totalorder %s410_s20, %s406_s19 }
  0x1e   : > { %s527_s8 = scalar_select %p55_p9, %s414_s21, %s57_s6  }
  0x1f   : > { %s530_s9 = scalar_select %p29_p12, %s426_s24, %s31_s30  }
  0x20   : > { %p532_p0 = por %p68_p11, %p67_p10  ;;  %p74_p1 = scmp.eq.s32.totalorder %s215_s26, 7 }
  0x21   : > { %p239_p3 = scmp.lt.s32.totalorder %s430_s0, 8  ;;  %s94_s12 = sand.u32 1, %s426_s24  }
  0x22   : > { %s661_s10 = scalar_select %p532_p0, 1, 0 }
  0x23   : > { %p536_p2 = por %p74_p1, %p73_p13  ;;  %p549_p4 = pnand %p239_p3, %p510_p7 }
  0x24   : > { %s223_s13 = scalar_select %p510_p7, [#allocation3], [#allocation8] }
  0x25   : > { %s662_s11 = scalar_select %p536_p2, 1, 0 }
  0x26   : > { %s224_s14 = scalar_select %p510_p7, %s430_s0, 0 }
  0x27   : > { %s676_s13 = smov (!%p239_p3, %s223_s13), [#allocation9]  ;;  %p219_p5 = scmp.ge.s32.totalorder %s430_s0, 1 }
  0x28   : > { %s678_s14 = smov (!%p239_p3, %s224_s14), 0  ;;  %s97_s17 = scalar_lea.vmem [#allocation4], %s94_s12 }
  0x29   : > { %s98_s16 = sld [smem:[%s676_s13 + %s678_s14]]  ;;  %s105_s18 = sshll.u32 %s97_s17, 4  ;;  %s559_s18 = int_to_ptr.vmem [resolvable:$true] %s105_s18 }
  0x2a   : > { %p110_p6 = scmp.lt.s32.totalorder %s430_s0, 9  ;;  %s95_s3 = scalar_lea.sflag [#allocation5], %s94_s12 }
  0x2b   : > { %p310_p10 = pneg %p549_p4  ;;  %s313_s13 = scalar_lea.hbm %s655_s1, 512 }
  0x2c   : > { %p555_p9 = pnand %p219_p5, %p110_p6 }
  0x2f   : > { %s218_s26 = sshll.u32 %s98_s16, 4 }
  0x30   : > { %s564_s30 = scalar_lea.hbm %s655_s1, %s218_s26 }
  0x31   : > { %s308_s4 = scalar_lea.hbm %s564_s30, 16  ;;  %p314_p13 = scmp.lt.u32.totalorder %s564_s30, %s655_s1 }
  0x32   : > { %p309_p7 = scmp.ne.s32.totalorder %s564_s30, %s308_s4  ;;  %p315_p1 = scmp.lt.u32.totalorder %s313_s13, %s308_s4 }
  0x33   : > { %p317_p5 = scmp.lt.u32.totalorder %s308_s4, %s564_s30 }
  0x34   : > { %p311_p11 = pnand %p310_p10, %p309_p7  ;;  %p316_p3 = por %p315_p1, %p314_p13 }
  0x36   : > { %p312_p12 = pneg %p311_p11  ;;  %p318_p6 = por %p317_p5, %p316_p3 }
  0x38   : > { %p319_p2 = pnand %p318_p6, %p312_p12 }
  0x3a   : > { %322 = shalt.err (!%p319_p2)
}
  0x3b   : > { %s323_s12 = scalar_lea.vmem %s559_s18, 16  ;;  %s433_s17 = smov [#allocation4]  }
  0x3c   : > { %p324_p7 = scmp.ne.s32.totalorder %s559_s18, %s323_s12  ;;  %s328_s26 = sshll.u32 %s433_s17, 4  ;;  %s329_s26 = int_to_ptr.vmem [resolvable:$false] %s328_s26 }
  0x3d   : > { %s330_s28 = scalar_lea.vmem %s329_s26, 32  ;;  %p331_p8 = scmp.lt.s32.totalorder %s559_s18, %s329_s26 }
  0x3e   : > { %p326_p11 = pnand %p324_p7, %p310_p10  ;;  %p332_p13 = scmp.lt.s32.totalorder %s330_s28, %s323_s12 }
  0x40   : > { %p327_p0 = pneg %p326_p11  ;;  %p333_p1 = por %p332_p13, %p331_p8 }
  0x42   : > { %p334_p3 = pnand %p333_p1, %p327_p0 }
  0x44   : > { %337 = shalt.err (!%p334_p3)
}
  0x45   : > { %234 = dma.hbm_to_vmem [thread:$0]  (!%p549_p4), %s564_s30, 16, %s559_s18, %s95_s3  }
  0x46   : > { %114 = sbr.rel (%p555_p9) target bundleno = 104 (0x68), region = 24  ;;  %s116_s29 = sand.u32 (!%p555_p9), 1, %s422_s23  }
  0x47   : > { %s117_s4 = scalar_lea.sflag (!%p555_p9), [#allocation5], %s116_s29  ;;  %s119_s6 = scalar_lea.vmem (!%p555_p9), [#allocation4], %s116_s29 }
  0x48   : > { %p665_p2 = scmp.ne.s32.totalorder (!%p555_p9), %s660_s5, 0 }
  0x4d   : > { %397 = dma.done.wait (%p665_p2), %s117_s4, 16  }
  0x4e   : > { %399 = vsyncadd (%p665_p2), %s117_s4, 4294967280  ;;  %s134_s15 = sand.u32 1, %s410_s20   ;;  %s220_s18 = sshll.u32 %s496_s25, 4  ;;  %v137_v0 = vld [vmem:[%s119_s6] sm:$0x1] }
  0x4f   : > { %s135_s7 = scalar_lea.vmem [#allocation7], %s134_s15  ;;  %s605_s3 = scalar_lea.hbm %s656_s2, %s220_s18 }
  0x50   : > { %s152_s13 = sshll.u32 %s135_s7, 4  ;;  %138 = vst [vmem:[%s135_s7] sm:$0x1] %v137_v0  ;;  %s140_s5 = scalar_lea.sflag [#allocation6], %s134_s15  ;;  %s600_s13 = int_to_ptr.vmem [resolvable:$true] %s152_s13 }
  0x51   : > { %s338_s14 = scalar_lea.vmem %s600_s13, 16  ;;  %p666_p0 = scmp.ne.s32.totalorder %s661_s10, 0 }
  0x52   : > { %p339_p8 = scmp.ne.s32.totalorder %s600_s13, %s338_s14  ;;  %s434_s16 = smov [#allocation7]  }
  0x53   : > { %s342_s25 = sshll.u32 %s434_s16, 4  ;;  %s343_s25 = int_to_ptr.vmem [resolvable:$false] %s342_s25 }
  0x54   : > { %p340_p4 = pnand %p339_p8, %p666_p0  ;;  %s344_s12 = scalar_lea.vmem %s343_s25, 32 }
  0x55   : > { %p345_p10 = scmp.lt.s32.totalorder %s600_s13, %s343_s25  ;;  %p346_p12 = scmp.lt.s32.totalorder %s344_s12, %s338_s14 }
  0x56   : > { %p341_p9 = pneg %p340_p4 }
  0x57   : > { %p347_p5 = por %p346_p12, %p345_p10 }
  0x59   : > { %p348_p6 = pnand %p347_p5, %p341_p9 }
  0x5b   : > { %351 = shalt.err (!%p348_p6)
}
  0x5c   : > { %s352_s17 = scalar_lea.hbm %s605_s3, 16  ;;  %s356_s29 = scalar_lea.hbm %s656_s2, 128 }
  0x5d   : > { %p353_p7 = scmp.ne.s32.totalorder %s605_s3, %s352_s17  ;;  %p357_p1 = scmp.lt.u32.totalorder %s605_s3, %s656_s2 }
  0x5e   : > { %p358_p3 = scmp.lt.u32.totalorder %s356_s29, %s352_s17  ;;  %p360_p8 = scmp.lt.u32.totalorder %s352_s17, %s605_s3 }
  0x5f   : > { %p354_p11 = pnand %p353_p7, %p666_p0 }
  0x60   : > { %p359_p2 = por %p358_p3, %p357_p1 }
  0x61   : > { %p355_p13 = pneg %p354_p11 }
  0x62   : > { %p361_p4 = por %p360_p8, %p359_p2 }
  0x64   : > { %p362_p9 = pnand %p361_p4, %p355_p13 }
  0x66   : > { %365 = shalt.err (!%p362_p9)
}
  0x67   : > { %227 = dma.vmem_to_hbm [thread:$0]  (%p666_p0), %s600_s13, 16, %s605_s3, %s140_s5  }
  0x68 PF: > { %p240_p10 = scmp.ge.s32.totalorder %s430_s0, 2  ;;  %s164_s15 = sand.u32 1, %s406_s19  }
  0x69   : > { %p667_p12 = scmp.ne.s32.totalorder %s662_s11, 0  ;;  %s165_s7 = scalar_lea.sflag [#allocation6], %s164_s15 }
  0x6b   : > { %p236_p5 = pnand %p240_p10, %p667_p12 }
  0x6d   : > { %401 = dma.done.wait (!%p236_p5), %s165_s7, 16  }
  0x6e   : > { %403 = vsyncadd (!%p236_p5), %s165_s7, 4294967280  ;;  %p19_p0 = scmp.ge.s32.totalorder %s500_s27, 10   ;;  %s668_s19 = smov %s410_s20 }
  0x6f   : > { %s669_s20 = smov %s414_s21  ;;  %s670_s21 = smov %s527_s8 }
  0x70   : > { %s671_s22 = smov %s422_s23  ;;  %s672_s23 = smov %s426_s24 }
  0x71   : > { %s673_s24 = smov %s530_s9  ;;  %s674_s0 = smov %s500_s27 }
  0x72   :  { %21 = sbr.rel (!%p19_p0) target bundleno = 19 (0x13), region = 69 }
  0x79   :  { %169 = vsyncpa [#allocation5], 1 }
  0x7a   :  { %171 = vsyncpa [#allocation5 + $0x1], 1 }
  0x7b   :  { %172 = vsyncpa [#allocation6], 1 }
  0x7c   :  { %174 = vsyncpa [#allocation6 + $0x1], 1 }

</bundles_post_ra>
